<compile_context>
chip_gen: v6e
topology: v6e:2x2x1
jax: 0.10.0
libtpu: 0.0.40
codegen_flags: <defaults>
</compile_context>

<pallas_src>
import jax
import jax.numpy as jnp
from jax.experimental import pallas as pl
from jax.experimental.pallas import tpu as pltpu  # noqa: F401  (imported for completeness)


def _soft_q_kernel(
    state_ref,                 # (B, num_inputs)
    action_ref,                # (B, num_actions)
    w1s_ref,                   # (num_inputs,  2H)  fused layer-1 weights (state rows)
    w1a_ref,                   # (num_actions, 2H)  fused layer-1 weights (action rows)
    b1_ref,                    # (1, 2H)
    w2_ref,                    # (2H, 2H)           block-diagonal fused layer-2
    b2_ref,                    # (1, 2H)
    w3_ref,                    # (2H, 2)            fused layer-3
    b3_ref,                    # (1, 2)
    out_ref,                   # (B, 2)             [q1 | q2]
):
    # Layer 1: (state|action) @ W1 + b1, done as two dots into one accumulator
    # so the concat never materializes.
    h = jnp.dot(state_ref[...], w1s_ref[...], preferred_element_type=jnp.float32)
    h = h + jnp.dot(action_ref[...], w1a_ref[...], preferred_element_type=jnp.float32)
    h = jnp.maximum(h + b1_ref[...], 0.0)

    # Layer 2: block-diagonal fused twin-head matmul + ReLU.
    h = jnp.dot(h, w2_ref[...], preferred_element_type=jnp.float32) + b2_ref[...]
    h = jnp.maximum(h, 0.0)

    # Layer 3: single (B, 2H) x (2H, 2) matmul -> lane-dense (B, 2) output.
    q = jnp.dot(h, w3_ref[...], preferred_element_type=jnp.float32) + b3_ref[...]
    out_ref[...] = q.astype(out_ref.dtype)


def prepare_params(params, num_inputs):
    """One-time (outside the hot path) fusion of the twin Q-heads.

    Takes PyTorch-layout params (W: (out, in), b: (out,)) and returns
    pre-transposed, head-fused tensors ready for the kernel.
    """
    H = params["q1_w1"].shape[0]

    # Layer 1: (D, 2H), split into state / action row blocks.
    w1 = jnp.concatenate([params["q1_w1"].T, params["q2_w1"].T], axis=1)   # (D, 2H)
    w1_s = w1[:num_inputs]                                                 # (num_inputs, 2H)
    w1_a = w1[num_inputs:]                                                 # (num_actions, 2H)
    b1 = jnp.concatenate([params["q1_b1"], params["q2_b1"]]).reshape(1, 2 * H)

    # Layer 2: block-diagonal (2H, 2H).
    w2 = jnp.zeros((2 * H, 2 * H), jnp.float32)
    w2 = w2.at[:H, :H].set(params["q1_w2"].T)
    w2 = w2.at[H:, H:].set(params["q2_w2"].T)
    b2 = jnp.concatenate([params["q1_b2"], params["q2_b2"]]).reshape(1, 2 * H)

    # Layer 3: (2H, 2) with each head's weights in its own column.
    w3 = jnp.zeros((2 * H, 2), jnp.float32)
    w3 = w3.at[:H, 0].set(params["q1_w3"][0])
    w3 = w3.at[H:, 1].set(params["q2_w3"][0])
    b3 = jnp.concatenate([params["q1_b3"], params["q2_b3"]]).reshape(1, 2)

    return {"w1_s": w1_s, "w1_a": w1_a, "b1": b1,
            "w2": w2, "b2": b2, "w3": w3, "b3": b3}


def soft_q_forward(state, action, prep):
    """Pallas implementation of SoftQNetwork.forward with fused heads.

    state:  (B, num_inputs)  float32
    action: (B, num_actions) float32
    prep:   output of prepare_params()
    Returns (q1, q2), each (B, 1).
    """
    B = state.shape[0]
    args = (state, action,
            prep["w1_s"], prep["w1_a"], prep["b1"],
            prep["w2"], prep["b2"],
            prep["w3"], prep["b3"])

    # Single grid point; all operands fit in VMEM, block_shape == array shape.
    def full(a):
        nd = a.ndim
        return pl.BlockSpec(a.shape, lambda: (0,) * nd)

    out = pl.pallas_call(
        _soft_q_kernel,
        grid=(),
        in_specs=[full(a) for a in args],
        out_specs=pl.BlockSpec((B, 2), lambda: (0, 0)),
        out_shape=jax.ShapeDtypeStruct((B, 2), jnp.float32),
    )(*args)

    # Split the lane-dense slab into the module's two (B, 1) outputs.
    return out[:, 0:1], out[:, 1:2]


def init_params(key, num_inputs, num_actions, hidden_size):
    """Deterministic init mimicking PyTorch nn.Linear default (U[-1/sqrt(fan_in), +])."""
    D = num_inputs + num_actions
    shapes = {
        "q1_w1": (hidden_size, D), "q1_b1": (hidden_size,),
        "q1_w2": (hidden_size, hidden_size), "q1_b2": (hidden_size,),
        "q1_w3": (1, hidden_size), "q1_b3": (1,),
        "q2_w1": (hidden_size, D), "q2_b1": (hidden_size,),
        "q2_w2": (hidden_size, hidden_size), "q2_b2": (hidden_size,),
        "q2_w3": (1, hidden_size), "q2_b3": (1,),
    }
    params = {}
    keys = jax.random.split(key, len(shapes))
    for k, (name, shp) in zip(keys, sorted(shapes.items())):
        fan_in = shp[-1] if len(shp) == 2 else shapes[name.replace("_b", "_w")][1]
        bound = 1.0 / jnp.sqrt(float(fan_in))
        params[name] = jax.random.uniform(k, shp, jnp.float32, -bound, bound)
    return params


def _reference(state, action, params):
    sa = jnp.concatenate([state, action], axis=1)

    def mlp(p, w1, b1, w2, b2, w3, b3):
        h = jax.nn.relu(sa @ p[w1].T + p[b1])
        h = jax.nn.relu(h @ p[w2].T + p[b2])
        return h @ p[w3].T + p[b3]

    return (mlp(params, "q1_w1", "q1_b1", "q1_w2", "q1_b2", "q1_w3", "q1_b3"),
            mlp(params, "q2_w1", "q2_b1", "q2_w2", "q2_b2", "q2_w3", "q2_b3"))


if __name__ == "__main__":
    num_inputs, num_actions, hidden_size = 16, 8, 32
    batch = 8

    key = jax.random.PRNGKey(0)
    k_state, k_action, k_params = jax.random.split(key, 3)
    state = jax.random.normal(k_state, (batch, num_inputs), jnp.float32)
    action = jax.random.normal(k_action, (batch, num_actions), jnp.float32)
    params = init_params(k_params, num_inputs, num_actions, hidden_size)

    # Head-fusion / transposes done once, outside the per-call hot path.
    prep = jax.tree_util.tree_map(jnp.asarray, prepare_params(params, num_inputs))

    q1, q2 = soft_q_forward(state, action, prep)
    jax.block_until_ready((q1, q2))

    q1_ref, q2_ref = _reference(state, action, params)
    assert q1.shape == (batch, 1) and q2.shape == (batch, 1)
    assert jnp.allclose(q1, q1_ref, atol=1e-5, rtol=1e-5)
    assert jnp.allclose(q2, q2_ref, atol=1e-5, rtol=1e-5)

    print("KERNEL_OK")
</pallas_src>

<mosaic_0001>
module attributes {stable_mosaic.version = 11 : i64} {
  func.func @_soft_q_kernel(%arg0: memref<8x16xf32, #tpu.memory_space<vmem>>, %arg1: memref<8x8xf32, #tpu.memory_space<vmem>>, %arg2: memref<16x64xf32, #tpu.memory_space<vmem>>, %arg3: memref<8x64xf32, #tpu.memory_space<vmem>>, %arg4: memref<1x64xf32, #tpu.memory_space<vmem>>, %arg5: memref<64x64xf32, #tpu.memory_space<vmem>>, %arg6: memref<1x64xf32, #tpu.memory_space<vmem>>, %arg7: memref<64x2xf32, #tpu.memory_space<vmem>>, %arg8: memref<1x2xf32, #tpu.memory_space<vmem>>, %arg9: memref<8x2xf32, #tpu.memory_space<vmem>>) attributes {dimension_semantics = [], scalar_prefetch = 0 : i64, scratch_operands = 0 : i64, tpu.core_type = #tpu.core_type<tc>} {
    %c0 = arith.constant 0 : index
    %c0_0 = arith.constant 0 : index
    %0 = vector.load %arg0[%c0, %c0_0] : memref<8x16xf32, #tpu.memory_space<vmem>>, vector<8x16xf32>
    %c0_1 = arith.constant 0 : index
    %c0_2 = arith.constant 0 : index
    %1 = vector.load %arg2[%c0_1, %c0_2] : memref<16x64xf32, #tpu.memory_space<vmem>>, vector<16x64xf32>
    %cst = arith.constant dense<0.000000e+00> : vector<8x64xf32>
    %2 = tpu.matmul %0, %1, %cst {dimension_numbers = #tpu.dot_dimension_numbers<[1], [0], [0], [1], [0, 0, 1, 1], [], []>} : vector<8x16xf32>, vector<16x64xf32>, vector<8x64xf32> -> vector<8x64xf32>
    %c0_3 = arith.constant 0 : index
    %c0_4 = arith.constant 0 : index
    %3 = vector.load %arg1[%c0_3, %c0_4] : memref<8x8xf32, #tpu.memory_space<vmem>>, vector<8x8xf32>
    %c0_5 = arith.constant 0 : index
    %c0_6 = arith.constant 0 : index
    %4 = vector.load %arg3[%c0_5, %c0_6] : memref<8x64xf32, #tpu.memory_space<vmem>>, vector<8x64xf32>
    %cst_7 = arith.constant dense<0.000000e+00> : vector<8x64xf32>
    %5 = tpu.matmul %3, %4, %cst_7 {dimension_numbers = #tpu.dot_dimension_numbers<[1], [0], [0], [1], [0, 0, 1, 1], [], []>} : vector<8x8xf32>, vector<8x64xf32>, vector<8x64xf32> -> vector<8x64xf32>
    %6 = arith.addf %2, %5 : vector<8x64xf32>
    %c0_8 = arith.constant 0 : index
    %c0_9 = arith.constant 0 : index
    %7 = vector.load %arg4[%c0_8, %c0_9] : memref<1x64xf32, #tpu.memory_space<vmem>>, vector<1x64xf32>
    %8 = vector.broadcast %7 : vector<1x64xf32> to vector<8x64xf32>
    %9 = arith.addf %6, %8 : vector<8x64xf32>
    %cst_10 = arith.constant 0.000000e+00 : f32
    %10 = vector.broadcast %cst_10 : f32 to vector<8x64xf32>
    %11 = arith.maximumf %9, %10 : vector<8x64xf32>
    %c0_11 = arith.constant 0 : index
    %c0_12 = arith.constant 0 : index
    %12 = vector.load %arg5[%c0_11, %c0_12] : memref<64x64xf32, #tpu.memory_space<vmem>>, vector<64x64xf32>
    %cst_13 = arith.constant dense<0.000000e+00> : vector<8x64xf32>
    %13 = tpu.matmul %11, %12, %cst_13 {dimension_numbers = #tpu.dot_dimension_numbers<[1], [0], [0], [1], [0, 0, 1, 1], [], []>} : vector<8x64xf32>, vector<64x64xf32>, vector<8x64xf32> -> vector<8x64xf32>
    %c0_14 = arith.constant 0 : index
    %c0_15 = arith.constant 0 : index
    %14 = vector.load %arg6[%c0_14, %c0_15] : memref<1x64xf32, #tpu.memory_space<vmem>>, vector<1x64xf32>
    %15 = vector.broadcast %14 : vector<1x64xf32> to vector<8x64xf32>
    %16 = arith.addf %13, %15 : vector<8x64xf32>
    %cst_16 = arith.constant 0.000000e+00 : f32
    %17 = vector.broadcast %cst_16 : f32 to vector<8x64xf32>
    %18 = arith.maximumf %16, %17 : vector<8x64xf32>
    %c0_17 = arith.constant 0 : index
    %c0_18 = arith.constant 0 : index
    %19 = vector.load %arg7[%c0_17, %c0_18] : memref<64x2xf32, #tpu.memory_space<vmem>>, vector<64x2xf32>
    %cst_19 = arith.constant dense<0.000000e+00> : vector<8x2xf32>
    %20 = tpu.matmul %18, %19, %cst_19 {dimension_numbers = #tpu.dot_dimension_numbers<[1], [0], [0], [1], [0, 0, 1, 1], [], []>} : vector<8x64xf32>, vector<64x2xf32>, vector<8x2xf32> -> vector<8x2xf32>
    %c0_20 = arith.constant 0 : index
    %c0_21 = arith.constant 0 : index
    %21 = vector.load %arg8[%c0_20, %c0_21] : memref<1x2xf32, #tpu.memory_space<vmem>>, vector<1x2xf32>
    %22 = vector.broadcast %21 : vector<1x2xf32> to vector<8x2xf32>
    %23 = arith.addf %20, %22 : vector<8x2xf32>
    %c0_22 = arith.constant 0 : index
    %c0_23 = arith.constant 0 : index
    %24 = vector.load %arg9[%c0_22, %c0_23] : memref<8x2xf32, #tpu.memory_space<vmem>>, vector<8x2xf32>
    tpu.vector_store %arg9[%c0_22, %c0_23], %23 {strides = array<i32>} : memref<8x2xf32, #tpu.memory_space<vmem>>, vector<8x2xf32>,
    return
  }
}

</mosaic_0001>

<bundles_post_ra>
// kernel: tpu_custom_call.1
= control target key start
LH: loop header
LB: loop body
LE: loop exit
PB: predicated region body
PF: predicated region fallthrough
CT: control target
= control target key end

     0   :  { %14 = vsyncpa [#allocation3], 0  ;;  %s726_s0 = inlined_call_operand.vmem [shape: f32[8,16], index: 0, kind: input, shape index: {}]   ;;  %s727_s1 = inlined_call_operand.hbm [shape: f32[8,8], index: 1, kind: input, shape index: {}]   ;;  %s728_s2 = inlined_call_operand.hbm [shape: f32[16,64], index: 2, kind: input, shape index: {}]   ;;  %s729_s3 = inlined_call_operand.hbm [shape: f32[8,64], index: 3, kind: input, shape index: {}]   ;;  %s730_s4 = inlined_call_operand.vmem [shape: f32[1,64], index: 4, kind: input, shape index: {}]   ;;  %s731_s5 = inlined_call_operand.vmem [shape: f32[64,64], index: 5, kind: input, shape index: {}]   ;;  %s732_s6 = inlined_call_operand.vmem [shape: f32[1,64], index: 6, kind: input, shape index: {}]   ;;  %s733_s7 = inlined_call_operand.vmem [shape: f32[64,2], index: 7, kind: input, shape index: {}]   ;;  %s734_s8 = inlined_call_operand.vmem [shape: f32[1,2], index: 8, kind: input, shape index: {}]   ;;  %s735_s9 = inlined_call_operand.vmem [shape: f32[8,2], index: 9, kind: output, shape index: {}]  }
   0x1   :  { %15 = vsyncpa [#allocation5], 0  ;;  %s568_s30 = smov [#allocation4]  }
   0x2   :  { %s33_s10 = sshll.u32 %s568_s30, 4  ;;  %s34_s10 = int_to_ptr.vmem [resolvable:$true] %s33_s10 }
   0x3   :  { %s512_s11 = scalar_lea.vmem %s34_s10, 256  ;;  %p517_p1 = scmp.lt.s32.totalorder %s34_s10, %s34_s10 }
   0x4   :  { %p513_p0 = scmp.ne.s32.totalorder %s34_s10, %s512_s11  ;;  %p518_p2 = scmp.lt.s32.totalorder %s512_s11, %s512_s11 }
   0x6   :  { %p519_p3 = por %p518_p2, %p517_p1 }
   0x8   :  { %p520_p4 = pnand %p519_p3, %p513_p0 }
   0xa   :  { %523 = shalt.err (!%p520_p4)
}
   0xb   :  { %s569_s12 = smov 128   ;;  %s570_s13 = smov 8  }
   0xc   :  { %39 = dma.hbm_to_vmem [thread:$0]  %s728_s2, 256, %s34_s10, [#allocation5], %s569_s12, %s569_s12, %s570_s13  }
   0xd   :  { %s571_s16 = smov [#allocation2]   ;;  %s572_s18 = smov [#allocation6]  }
   0xe   :  { %s24_s17 = sshll.u32 %s571_s16, 4  ;;  %s46_s19 = sshll.u32 %s572_s18, 4  ;;  %s25_s17 = int_to_ptr.vmem [resolvable:$true] %s24_s17  ;;  %s47_s19 = int_to_ptr.vmem [resolvable:$true] %s46_s19 }
   0xf   :  { %s532_s20 = scalar_lea.vmem %s25_s17, 128  ;;  %p537_p6 = scmp.lt.s32.totalorder %s25_s17, %s25_s17 }
  0x10   :  { %p533_p5 = scmp.ne.s32.totalorder %s25_s17, %s532_s20  ;;  %p538_p7 = scmp.lt.s32.totalorder %s532_s20, %s532_s20 }
  0x12   :  { %p539_p8 = por %p538_p7, %p537_p6 }
  0x14   :  { %p540_p9 = pnand %p539_p8, %p533_p5 }
  0x16   :  { %543 = shalt.err (!%p540_p9)
}
  0x17   :  { %27 = dma.hbm_to_vmem [thread:$0]  %s727_s1, 128, %s25_s17, [#allocation3]  }
  0x18   :  { %s552_s23 = scalar_lea.vmem %s47_s19, 128  ;;  %p557_p11 = scmp.lt.s32.totalorder %s47_s19, %s47_s19 }
  0x19   :  { %p553_p10 = scmp.ne.s32.totalorder %s47_s19, %s552_s23  ;;  %p558_p12 = scmp.lt.s32.totalorder %s552_s23, %s552_s23 }
  0x1b   :  { %p559_p13 = por %p558_p12, %p557_p11 }
  0x1d   :  { %p560_p0 = pnand %p559_p13, %p553_p10 }
  0x1f   :  { %563 = shalt.err (!%p560_p0)
}
  0x20   :  { %49 = dma.hbm_to_vmem [thread:$0]  %s729_s3, 128, %s47_s19, [#allocation5]  }
  0x21   :  { %564 = dma.done.wait [#allocation3], 128  }
  0x22   :  { %565 = vsyncadd [#allocation3], 4294967168 }
  0x23   :  { %566 = dma.done.wait [#allocation5], 384  }
  0x24   :  { %567 = vsyncadd [#allocation5], 4294966912  ;;  %v573_v0 = vmov 0.0   ;;  %vm574_vm0 = vmmov 0   ;;  %vm74_vm1 = vcmask 64512   ;;  %v73_v1 = vld [vmem:[#allocation6] sm:$0xff] }
  0x25   :  { %447 = vmatprep.subr.mxu0 %v573_v0  ;;  %452 = vmatprep.subr.mxu1 %v573_v0  ;;  %v71_v2 = vld [vmem:[#allocation4 + $0x8] sm:$0xff]  ;;  %v72_v3 = vld [vmem:[#allocation2] sm:$0xff]  ;;  %v70_v4 = vld [vmem:[#allocation4] sm:$0xff]  ;;  %vm148_vm2 = vcmask 130048   ;;  %vm246_vm3 = vcmask 523264   ;;  %vm409_vm4 = vcmask 15360  }
  0x26   :  { %449 = vmatprep.mubr.msk.f32.mxu0 %vm574_vm0, %v573_v0  ;;  %456 = vmatprep.mubr.msk.f32.mxu1 %vm574_vm0, %v573_v0  ;;  %v69_v5 = vld [vmem:[%s726_s0] sm:$0xff]  ;;  %v238_v6 = vld [vmem:[%s731_s5 + $0x38] sm:$0xff]  ;;  %v237_v7 = vld [vmem:[%s731_s5 + $0x30] sm:$0xff] }
  0x27   :  { %448 = vmatpush3.msra.mxu0 %v73_v1  ;;  %453 = vmatpush3.msra.mxu1 %v71_v2  ;;  %v236_v8 = vld [vmem:[%s731_s5 + $0x28] sm:$0xff]  ;;  %v235_v9 = vld [vmem:[%s731_s5 + $0x20] sm:$0xff]  ;;  %v234_v10 = vld [vmem:[%s731_s5 + $0x18] sm:$0xff] }
  0x28   :  { %450 = vmatmul.mubr.msk.f32.vlgmr.msra.gmra.mxu0 %vm74_vm1, %v72_v3  ;;  %454 = vmatprep.subr.mxu1 %v573_v0  ;;  %v233_v11 = vld [vmem:[%s731_s5 + $0x10] sm:$0xff]  ;;  %v232_v12 = vld [vmem:[%s731_s5 + $0x8] sm:$0xff]  ;;  %v231_v13 = vld [vmem:[%s731_s5] sm:$0xff] }
  0x29   :  { %455 = vmatpush3.msra.mxu1 %v70_v4  ;;  %459 = vmatprep.subr.mxu0 %v573_v0  ;;  %v328_v14 = vld [vmem:[%s733_s7 + $0x38] sm:$0xff]  ;;  %v327_v15 = vld [vmem:[%s733_s7 + $0x30] sm:$0xff]  ;;  %v326_v16 = vld [vmem:[%s733_s7 + $0x28] sm:$0xff] }
  0x2a   :  { %457 = vmatmul.mubr.msk.f32.vlgmr.msra.gmra.mxu1 %vm148_vm2, %v69_v5  ;;  %460 = vmatpush3.msra.mxu0 %v238_v6  ;;  %v325_v17 = vld [vmem:[%s733_s7 + $0x20] sm:$0xff]  ;;  %v324_v18 = vld [vmem:[%s733_s7 + $0x18] sm:$0xff]  ;;  %v323_v27 = vld [vmem:[%s733_s7 + $0x10] sm:$0xff] }
  0x2b   :  { %461 = vmatprep.subr.mxu0 %v573_v0  ;;  %475 = vmatprep.mubr.msk.f32.mxu0 %vm574_vm0, %v573_v0  ;;  %v419_v22 = vld [vmem:[%s730_s4] ss:$0 sm:$0xff]  ;;  %v322_v28 = vld [vmem:[%s733_s7 + $0x8] sm:$0xff] }
  0x2c   :  { %462 = vmatpush3.msra.mxu0 %v237_v7  ;;  %478 = vmatprep.subr.mxu1 %v573_v0  ;;  %v321_v29 = vld [vmem:[%s733_s7] sm:$0xff] }
  0x2d   :  { %463 = vmatprep.subr.mxu0 %v573_v0  ;;  %494 = vmatprep.mubr.msk.f32.mxu1 %vm574_vm0, %v573_v0  ;;  %v420_v30 = vld [vmem:[%s732_s6] ss:$0 sm:$0xff] }
  0x2e   :  { %464 = vmatpush3.msra.mxu0 %v236_v8  ;;  %479 = vmatpush3.msra.mxu1 %v328_v14  ;;  %v422_v35 = vld [vmem:[%s734_s8] ss:$0 sm:$0xff] }
  0x2f   :  { %465 = vmatprep.subr.mxu0 %v573_v0  ;;  %480 = vmatprep.subr.mxu1 %v573_v0 }
  0x30   :  { %466 = vmatpush3.msra.mxu0 %v235_v9  ;;  %481 = vmatpush3.msra.mxu1 %v327_v15 }
  0x31   :  { %467 = vmatprep.subr.mxu0 %v573_v0  ;;  %482 = vmatprep.subr.mxu1 %v573_v0 }
  0x32   :  { %468 = vmatpush3.msra.mxu0 %v234_v10  ;;  %483 = vmatpush3.msra.mxu1 %v326_v16 }
  0x33   :  { %469 = vmatprep.subr.mxu0 %v573_v0  ;;  %484 = vmatprep.subr.mxu1 %v573_v0 }
  0x34   :  { %470 = vmatpush3.msra.mxu0 %v233_v11  ;;  %485 = vmatpush3.msra.mxu1 %v325_v17 }
  0x35   :  { %471 = vmatprep.subr.mxu0 %v573_v0  ;;  %486 = vmatprep.subr.mxu1 %v573_v0 }
  0x36   :  { %472 = vmatpush3.msra.mxu0 %v232_v12  ;;  %487 = vmatpush3.msra.mxu1 %v324_v18 }
  0x37   :  { %473 = vmatprep.subr.mxu0 %v573_v0  ;;  %488 = vmatprep.subr.mxu1 %v573_v0 }
  0x38   :  { %474 = vmatpush3.msra.mxu0 %v231_v13  ;;  %489 = vmatpush3.msra.mxu1 %v323_v27 }
  0x39   :  { %490 = vmatprep.subr.mxu1 %v573_v0 }
  0x3a   :  { %491 = vmatpush3.msra.mxu1 %v322_v28 }
  0x3b   :  { %492 = vmatprep.subr.mxu1 %v573_v0 }
  0x3c   :  { %493 = vmatpush3.msra.mxu1 %v321_v29 }
  0xe8   :  { %v144_v19 = vpop.f32.mrf.mxu0 }
  0xea   :  { %v451_v20 = vpop.f32.mrf.mxu0  ;;  %v218_v21 = vpop.f32.mrf.mxu1 }
  0xeb   :  { %v219_v23 = vadd.f32 %v218_v21, %v144_v19 }
  0xec   :  { %v458_v24 = vpop.f32.mrf.mxu1 }
  0xed   :  { %v229_v25 = vadd.f32 %v419_v22, %v219_v23 }
  0xef   :  { %v230_v26 = vmax.f32 %v229_v25, 0.0 }
  0xf1   :  { %476 = vmatmul.mubr.msk.f32.vlgmr.msra.gmra.mxu0 %vm246_vm3, %v230_v26 }
 0x1b1   :  { %v316_v31 = vpop.f32.mrf.mxu0 }
 0x1b2   :  { %v317_v32 = vadd.f32 %v420_v30, %v316_v31 }
 0x1b3   :  { %v477_v33 = vpop.f32.mrf.mxu0 }
 0x1b4   :  { %v320_v34 = vmax.f32 %v317_v32, 0.0 }
 0x1b6   :  { %495 = vmatmul.mubr.msk.f32.vlgmr.msra.gmra.mxu1 %vm246_vm3, %v320_v34 }
 0x276   :  { %v405_v36 = vpop.f32.mrf.mxu1 }
 0x277   :  { %v406_v37 = vadd.f32 %v422_v35, %v405_v36 }
 0x278   :  { %v496_v38 = vpop.f32.mrf.mxu1 }
 0x279   :  { %410 = vst.msk [vmem:[%s735_s9] sm:$0xff] %vm409_vm4, %v406_v37 }
 0x27a   :  { %415 = vsyncpa [#allocation3], 1 }
 0x27b   :  { %416 = vsyncpa [#allocation5], 1 }

</bundles_post_ra>
